<compile_context>
chip_gen: v7x
topology: tpu7x:2x2x1
jax: 0.10.0
libtpu: 0.0.40
codegen_flags: <defaults>
</compile_context>

<pallas_src>
import functools

import jax
import jax.numpy as jnp
import numpy as np
from jax.experimental import pallas as pl
from jax.experimental.pallas import tpu as pltpu

LANE = 128
SUBLANE = 8
BASE = 128  # front/back lane margin so every 3x3 tap shift stays in bounds


def _rup(x, m):
    return ((x + m - 1) // m) * m


# ---------------------------------------------------------------------------
# Padded-flat ("PF") activation layout
#   logical (B, C, H, W)  ->  (B, C_p, Lbuf) with C_p = rup(C, 8),
#   raster = (H+2, W+2) including the conv "same" zero ring,
#   buffer[:, BASE + i*(W+2) + j] = padded pixel (i, j), zeros elsewhere,
#   Lbuf = rup((H+2)*(W+2), 128) + 2*BASE.
#   A 3x3 stride-1 conv is then 9 matmuls on constant-lane-shifted slices.
# ---------------------------------------------------------------------------
def pack_pf(x, cp):
    b, c, h, w = x.shape
    hp, wp = h + 2, w + 2
    lc = _rup(hp * wp, LANE)
    lbuf = lc + 2 * BASE
    xp = jnp.pad(x, ((0, 0), (0, cp - c), (1, 1), (1, 1)))
    xp = xp.reshape(b, cp, hp * wp)
    return jnp.pad(xp, ((0, 0), (0, 0), (BASE, lbuf - BASE - hp * wp)))


def unpack_pf(buf, c, h, w):
    hp, wp = h + 2, w + 2
    b = buf.shape[0]
    body = buf[:, :c, BASE:BASE + hp * wp].reshape(b, c, hp, wp)
    return body[:, :, 1:1 + h, 1:1 + w]


def valid_mask(h, w):
    """(1, lc) f32: 1.0 on interior raster positions, 0.0 on the pad ring / tail."""
    hp, wp = h + 2, w + 2
    lc = _rup(hp * wp, LANE)
    idx = np.arange(lc)
    i, j = idx // wp, idx % wp
    ok = (idx < hp * wp) & (i >= 1) & (i <= h) & (j >= 1) & (j <= w)
    return jnp.asarray(ok.astype(np.float32)).reshape(1, lc)


def tap_offsets(w):
    """Constant lane offsets of the 9 taps of a 3x3 stride-1 same-pad conv."""
    wp = w + 2
    return tuple((di - 1) * wp + (dj - 1) for di in range(3) for dj in range(3))


def gather_patches(x, stride):
    """Strided 3x3 patches for the stride!=1 conv1: (B, 9*C, Ho, Wo)."""
    b, c, h, w = x.shape
    ho = (h - 1) // stride + 1
    wo = (w - 1) // stride + 1
    xp = jnp.pad(x.astype(jnp.float32), ((0, 0), (0, 0), (1, 1), (1, 1)))
    cols = []
    for di in range(3):
        for dj in range(3):
            cols.append(xp[:, :, di:di + (ho - 1) * stride + 1:stride,
                               dj:dj + (wo - 1) * stride + 1:stride])
    patches = jnp.stack(cols, axis=1).reshape(b, 9 * c, ho, wo)
    return patches, ho, wo


# ------------------------------- parameter prep ------------------------------
def fold_bn(gamma, beta, mean, var, eps=1e-5):
    scale = gamma / jnp.sqrt(var + eps)
    return scale, beta - mean * scale


def _col(v):
    c = v.shape[0]
    cp = _rup(c, SUBLANE)
    return jnp.pad(v.astype(jnp.float32), (0, cp - c)).reshape(cp, 1)


def _conv3x3_taps(w):
    """(Cout, Cin, 3, 3) -> (9, Cout_p, Cin_p) bf16, tap-major."""
    co, ci = w.shape[:2]
    t = jnp.transpose(w, (2, 3, 0, 1)).reshape(9, co, ci)
    t = jnp.pad(t, ((0, 0), (0, _rup(co, SUBLANE) - co), (0, _rup(ci, SUBLANE) - ci)))
    return t.astype(jnp.bfloat16)


def _conv3x3_gathered(w):
    """(Cout, Cin, 3, 3) -> (1, Cout_p, 9*Cin padded) bf16, matching gather_patches."""
    co, ci = w.shape[:2]
    t = jnp.transpose(w, (2, 3, 1, 0)).reshape(9 * ci, co).T
    t = jnp.pad(t, ((0, _rup(co, SUBLANE) - co), (0, _rup(9 * ci, SUBLANE) - 9 * ci)))
    return t[None].astype(jnp.bfloat16)


def _conv1x1(w):
    co, ci = w.shape[:2]
    t = w.reshape(co, ci)
    t = jnp.pad(t, ((0, _rup(co, SUBLANE) - co), (0, _rup(ci, SUBLANE) - ci)))
    return t[None].astype(jnp.bfloat16)


def prepare_block_params(params, stride, eps=1e-5):
    planes, in_planes = params["w1"].shape[:2]
    out_planes = params["w2"].shape[0]
    s1, b1 = fold_bn(*params["bn1"], eps)
    s2, b2 = fold_bn(*params["bn2"], eps)
    prep = {
        "planes": int(planes), "in_planes": int(in_planes),
        "out_planes": int(out_planes),
        "s1": _col(s1), "b1": _col(b1), "s2": _col(s2), "b2": _col(b2),
        "w2_taps": _conv3x3_taps(params["w2"]),
        "has_downsample": "wd" in params,
    }
    if stride == 1:
        prep["w1_taps"] = _conv3x3_taps(params["w1"])
    else:
        prep["w1_gathered"] = _conv3x3_gathered(params["w1"])
    if "wd" in params:
        sd, bd = fold_bn(*params["bnd"], eps)
        prep["wd"] = _conv1x1(params["wd"])
        prep["sd"], prep["bd"] = _col(sd), _col(bd)
    return prep


# --------------------------------- the kernel --------------------------------
def _basic_block_kernel(*refs, offs1, offs2, base, lc, has_ds):
    """One grid step = one image: conv1+bn1+relu -> VMEM -> conv2+bn2+shortcut+relu."""
    if has_ds:
        (x_ref, w1_ref, s1_ref, b1_ref, w2_ref, s2_ref, b2_ref,
         xd_ref, wd_ref, sd_ref, bd_ref, m_ref, o_ref, h_ref) = refs
    else:
        (x_ref, w1_ref, s1_ref, b1_ref, w2_ref, s2_ref, b2_ref,
         r_ref, m_ref, o_ref, h_ref) = refs

    keep = m_ref[...] != 0.0                       # (1, lc): interior positions

    # ---- conv1 (sum of lane-shifted matmuls) + bn1 + relu -> VMEM scratch ----
    acc = None
    for t, off in enumerate(offs1):
        xt = x_ref[0, :, base + off:base + off + lc]          # (Cin_p, lc) bf16
        part = jnp.dot(w1_ref[t], xt, preferred_element_type=jnp.float32)
        acc = part if acc is None else acc + part
    hid = jnp.maximum(acc * s1_ref[...] + b1_ref[...], 0.0)
    hid = jnp.where(keep, hid, 0.0)                # keep the zero pad ring exact
    hrows, hbuf = h_ref.shape
    h_ref[:, :base] = jnp.zeros((hrows, base), h_ref.dtype)
    h_ref[:, base + lc:] = jnp.zeros((hrows, hbuf - base - lc), h_ref.dtype)
    h_ref[:, base:base + lc] = hid.astype(h_ref.dtype)

    # ---- conv2 + bn2 + shortcut + relu -> output ----
    acc2 = None
    for t, off in enumerate(offs2):
        ht = h_ref[:, base + off:base + off + lc]             # (planes_p, lc) bf16
        part = jnp.dot(w2_ref[t], ht, preferred_element_type=jnp.float32)
        acc2 = part if acc2 is None else acc2 + part
    out = acc2 * s2_ref[...] + b2_ref[...]
    if has_ds:
        xd = xd_ref[0, :, base:base + lc]                     # (Cin_p, lc) bf16
        ds = jnp.dot(wd_ref[0], xd, preferred_element_type=jnp.float32)
        out = out + ds * sd_ref[...] + bd_ref[...]
    else:
        out = out + r_ref[0, :, base:base + lc]               # f32 identity shortcut
    out = jnp.where(keep, jnp.maximum(out, 0.0), 0.0)

    cout_p, lbuf = o_ref.shape[1], o_ref.shape[2]
    o_ref[0, :, :base] = jnp.zeros((cout_p, base), o_ref.dtype)
    o_ref[0, :, base + lc:] = jnp.zeros((cout_p, lbuf - base - lc), o_ref.dtype)
    o_ref[0, :, base:base + lc] = out.astype(o_ref.dtype)


def basic_block_call(x_pf, w1, s1, b1, w2, s2, b2, mask, offs1, offs2, *,
                     residual=None, downsample=None, out_dtype=jnp.float32):
    assert (residual is None) != (downsample is None)
    B, _, lbuf = x_pf.shape
    lc = lbuf - 2 * BASE
    assert mask.shape == (1, lc)
    cout_p = w2.shape[1]
    planes_p = w2.shape[2]

    def _per_image(arr):
        return pl.BlockSpec((1,) + arr.shape[1:], lambda b: (b, 0, 0))

    def _replicated(arr):
        n = arr.ndim
        return pl.BlockSpec(arr.shape, lambda b, n=n: (0,) * n)

    inputs = [x_pf, w1, s1, b1, w2, s2, b2]
    in_specs = [_per_image(x_pf)] + [_replicated(a) for a in (w1, s1, b1, w2, s2, b2)]
    if downsample is not None:
        xd, wd, sd, bd = downsample
        inputs += [xd, wd, sd, bd]
        in_specs += [_per_image(xd), _replicated(wd), _replicated(sd), _replicated(bd)]
        has_ds = True
    else:
        inputs.append(residual)
        in_specs.append(_per_image(residual))
        has_ds = False
    inputs.append(mask)
    in_specs.append(_replicated(mask))

    flops = 2 * B * lc * (len(offs1) * w1.shape[1] * w1.shape[2]
                          + len(offs2) * w2.shape[1] * w2.shape[2])
    if has_ds:
        flops += 2 * B * lc * wd.shape[1] * wd.shape[2]
    bytes_accessed = (sum(int(np.prod(a.shape)) * a.dtype.itemsize for a in inputs)
                      + B * cout_p * lbuf * jnp.dtype(out_dtype).itemsize)

    kernel = functools.partial(_basic_block_kernel, offs1=tuple(offs1),
                               offs2=tuple(offs2), base=BASE, lc=lc, has_ds=has_ds)
    return pl.pallas_call(
        kernel,
        out_shape=jax.ShapeDtypeStruct((B, cout_p, lbuf), out_dtype),
        grid_spec=pltpu.PrefetchScalarGridSpec(
            num_scalar_prefetch=0,
            grid=(B,),
            in_specs=in_specs,
            out_specs=pl.BlockSpec((1, cout_p, lbuf), lambda b: (b, 0, 0)),
            scratch_shapes=[pltpu.VMEM((planes_p, lbuf), jnp.bfloat16)]),
        compiler_params=pltpu.CompilerParams(
            dimension_semantics=("parallel",)),
        cost_estimate=pl.CostEstimate(
            flops=int(flops), transcendentals=0, bytes_accessed=int(bytes_accessed)),
    )(*inputs)


# ------------------------------- block forward -------------------------------
def basic_block_forward(x_nchw, prep, stride):
    """Pallas implementation of BasicBlock.forward. Input/output NCHW float32."""
    B, cin, H, W = x_nchw.shape
    out_planes = prep["out_planes"]
    ho = (H - 1) // stride + 1
    wo = (W - 1) // stride + 1
    assert wo + 3 <= BASE, "spatial width too large for single-window kernel"

    if stride == 1:
        x_pf32 = pack_pf(x_nchw.astype(jnp.float32), _rup(cin, SUBLANE))
        conv1_in = x_pf32.astype(jnp.bfloat16)
        w1, offs1 = prep["w1_taps"], tap_offsets(W)
    else:
        x_pf32 = None
        patches, ho, wo = gather_patches(x_nchw, stride)
        conv1_in = pack_pf(patches, _rup(9 * cin, SUBLANE)).astype(jnp.bfloat16)
        w1, offs1 = prep["w1_gathered"], (0,)

    mask = valid_mask(ho, wo)
    offs2 = tap_offsets(wo)

    if prep["has_downsample"]:
        xd = pack_pf(x_nchw[:, :, ::stride, ::stride].astype(jnp.float32),
                     _rup(cin, SUBLANE)).astype(jnp.bfloat16)
        out_pf = basic_block_call(
            conv1_in, w1, prep["s1"], prep["b1"],
            prep["w2_taps"], prep["s2"], prep["b2"], mask, offs1, offs2,
            downsample=(xd, prep["wd"], prep["sd"], prep["bd"]))
    else:
        assert stride == 1 and cin == out_planes, (
            "identity shortcut requires stride==1 and in_planes==out_planes")
        out_pf = basic_block_call(
            conv1_in, w1, prep["s1"], prep["b1"],
            prep["w2_taps"], prep["s2"], prep["b2"], mask, offs1, offs2,
            residual=x_pf32)

    return unpack_pf(out_pf, out_planes, ho, wo)


# ----------------------------- pure-JAX reference ----------------------------
def _ref_conv(x, w, stride, pad):
    return jax.lax.conv_general_dilated(
        x, w, (stride, stride), ((pad, pad), (pad, pad)),
        dimension_numbers=("NCHW", "OIHW", "NCHW"))


def _ref_bn(x, gamma, beta, mean, var, eps=1e-5):
    g = gamma[None, :, None, None]
    b = beta[None, :, None, None]
    m = mean[None, :, None, None]
    v = var[None, :, None, None]
    return (x - m) / jnp.sqrt(v + eps) * g + b


def basic_block_reference(x, params, stride):
    out = jax.nn.relu(_ref_bn(_ref_conv(x, params["w1"], stride, 1), *params["bn1"]))
    out = _ref_bn(_ref_conv(out, params["w2"], 1, 1), *params["bn2"])
    if "wd" in params:
        ds = _ref_bn(_ref_conv(x, params["wd"], stride, 0), *params["bnd"])
    else:
        ds = x
    return jax.nn.relu(out + ds)


# ----------------------------------- main -------------------------------------
if __name__ == "__main__":
    key = jax.random.PRNGKey(0)
    ks = jax.random.split(key, 20)

    def bn_params(k, c):
        k1, k2, k3, k4 = jax.random.split(k, 4)
        gamma = 1.0 + 0.1 * jax.random.normal(k1, (c,), jnp.float32)
        beta = 0.1 * jax.random.normal(k2, (c,), jnp.float32)
        mean = 0.1 * jax.random.normal(k3, (c,), jnp.float32)
        var = jax.random.uniform(k4, (c,), jnp.float32, 0.5, 1.5)
        return (gamma, beta, mean, var)

    # bf16 matmul operands (f32 accumulate / f32 shortcut) vs f32 reference.
    RTOL, ATOL = 5e-2, 1e-1

    # ---- Block A: stride=2, Cin != Cout -> fused 1x1-conv+BN downsample branch
    in_planes, planes, out_planes, stride = 4, 4, 8, 2
    N, H, W = 2, 16, 16
    xA = jax.random.normal(ks[0], (N, in_planes, H, W), jnp.float32)
    paramsA = {
        "w1": 0.2 * jax.random.normal(ks[1], (planes, in_planes, 3, 3), jnp.float32),
        "bn1": bn_params(ks[2], planes),
        "w2": 0.2 * jax.random.normal(ks[3], (out_planes, planes, 3, 3), jnp.float32),
        "bn2": bn_params(ks[4], out_planes),
        "wd": 0.2 * jax.random.normal(ks[5], (out_planes, in_planes, 1, 1), jnp.float32),
        "bnd": bn_params(ks[6], out_planes),
    }
    prepA = prepare_block_params(paramsA, stride)
    fwdA = jax.jit(functools.partial(basic_block_forward, prep=prepA, stride=stride))
    outA = jax.block_until_ready(fwdA(xA))
    refA = jax.block_until_ready(basic_block_reference(xA, paramsA, stride))
    assert outA.shape == (N, out_planes, H // stride, W // stride), outA.shape
    np.testing.assert_allclose(np.asarray(outA), np.asarray(refA),
                               rtol=RTOL, atol=ATOL)

    # ---- Block B: stride=1, Cin == Cout -> identity shortcut path
    c = 8
    xB = jax.random.normal(ks[7], (N, c, 8, 8), jnp.float32)
    paramsB = {
        "w1": 0.2 * jax.random.normal(ks[8], (c, c, 3, 3), jnp.float32),
        "bn1": bn_params(ks[9], c),
        "w2": 0.2 * jax.random.normal(ks[10], (c, c, 3, 3), jnp.float32),
        "bn2": bn_params(ks[11], c),
    }
    prepB = prepare_block_params(paramsB, 1)
    fwdB = jax.jit(functools.partial(basic_block_forward, prep=prepB, stride=1))
    outB = jax.block_until_ready(fwdB(xB))
    refB = jax.block_until_ready(basic_block_reference(xB, paramsB, 1))
    assert outB.shape == xB.shape, outB.shape
    np.testing.assert_allclose(np.asarray(outB), np.asarray(refB),
                               rtol=RTOL, atol=ATOL)

    print("KERNEL_OK")
</pallas_src>

<mosaic_0001>
module attributes {stable_mosaic.version = 11 : i64} {
  func.func @_basic_block_kernel(%arg0: i32, %arg1: memref<1x40x384xbf16, #tpu.memory_space<vmem>>, %arg2: memref<1x8x40xbf16, #tpu.memory_space<vmem>>, %arg3: memref<8x1xf32, #tpu.memory_space<vmem>>, %arg4: memref<8x1xf32, #tpu.memory_space<vmem>>, %arg5: memref<9x8x8xbf16, #tpu.memory_space<vmem>>, %arg6: memref<8x1xf32, #tpu.memory_space<vmem>>, %arg7: memref<8x1xf32, #tpu.memory_space<vmem>>, %arg8: memref<1x8x384xbf16, #tpu.memory_space<vmem>>, %arg9: memref<1x8x8xbf16, #tpu.memory_space<vmem>>, %arg10: memref<8x1xf32, #tpu.memory_space<vmem>>, %arg11: memref<8x1xf32, #tpu.memory_space<vmem>>, %arg12: memref<1x128xf32, #tpu.memory_space<vmem>>, %arg13: memref<1x8x384xf32, #tpu.memory_space<vmem>>, %arg14: memref<8x384xbf16, #tpu.memory_space<vmem>>) attributes {dimension_semantics = [#tpu.dimension_semantics<parallel>], iteration_bounds = array<i64: 2>, scalar_prefetch = 0 : i64, scratch_operands = 1 : i64, tpu.core_type = #tpu.core_type<tc>, window_params = [{transform_indices = @transform_0, window_bounds = array<i64: 1, 40, 384>}, {pipeline_mode = #tpu.pipeline_mode<synchronous>, transform_indices = @transform_1, window_bounds = array<i64: 1, 8, 40>}, {pipeline_mode = #tpu.pipeline_mode<synchronous>, transform_indices = @transform_2, window_bounds = array<i64: 8, 1>}, {pipeline_mode = #tpu.pipeline_mode<synchronous>, transform_indices = @transform_3, window_bounds = array<i64: 8, 1>}, {pipeline_mode = #tpu.pipeline_mode<synchronous>, transform_indices = @transform_4, window_bounds = array<i64: 9, 8, 8>}, {pipeline_mode = #tpu.pipeline_mode<synchronous>, transform_indices = @transform_5, window_bounds = array<i64: 8, 1>}, {pipeline_mode = #tpu.pipeline_mode<synchronous>, transform_indices = @transform_6, window_bounds = array<i64: 8, 1>}, {transform_indices = @transform_7, window_bounds = array<i64: 1, 8, 384>}, {pipeline_mode = #tpu.pipeline_mode<synchronous>, transform_indices = @transform_8, window_bounds = array<i64: 1, 8, 8>}, {pipeline_mode = #tpu.pipeline_mode<synchronous>, transform_indices = @transform_9, window_bounds = array<i64: 8, 1>}, {pipeline_mode = #tpu.pipeline_mode<synchronous>, transform_indices = @transform_10, window_bounds = array<i64: 8, 1>}, {pipeline_mode = #tpu.pipeline_mode<synchronous>, transform_indices = @transform_11, window_bounds = array<i64: 1, 128>}, {transform_indices = @transform_12, window_bounds = array<i64: 1, 8, 384>}]} {
    %c0 = arith.constant 0 : index
    %c0_0 = arith.constant 0 : index
    %0 = vector.load %arg12[%c0, %c0_0] : memref<1x128xf32, #tpu.memory_space<vmem>>, vector<1x128xf32>
    %cst = arith.constant 0.000000e+00 : f32
    %1 = vector.broadcast %cst : f32 to vector<1x128xf32>
    %2 = arith.cmpf one, %0, %1 : vector<1x128xf32>
    %c0_1 = arith.constant 0 : index
    %c0_2 = arith.constant 0 : index
    %c128 = arith.constant 128 : index
    %3 = vector.load %arg1[%c0_1, %c0_2, %c128] : memref<1x40x384xbf16, #tpu.memory_space<vmem>>, vector<1x40x128xbf16>
    %4 = vector.shape_cast %3 : vector<1x40x128xbf16> to vector<40x128xbf16>
    %c0_3 = arith.constant 0 : index
    %c0_4 = arith.constant 0 : index
    %c0_5 = arith.constant 0 : index
    %5 = vector.load %arg2[%c0_3, %c0_4, %c0_5] : memref<1x8x40xbf16, #tpu.memory_space<vmem>>, vector<1x8x40xbf16>
    %6 = vector.shape_cast %5 : vector<1x8x40xbf16> to vector<8x40xbf16>
    %cst_6 = arith.constant dense<0.000000e+00> : vector<8x128xf32>
    %7 = tpu.matmul %6, %4, %cst_6 {dimension_numbers = #tpu.dot_dimension_numbers<[1], [0], [0], [1], [0, 0, 1, 1], [], []>} : vector<8x40xbf16>, vector<40x128xbf16>, vector<8x128xf32> -> vector<8x128xf32>
    %c0_7 = arith.constant 0 : index
    %c0_8 = arith.constant 0 : index
    %8 = vector.load %arg3[%c0_7, %c0_8] : memref<8x1xf32, #tpu.memory_space<vmem>>, vector<8x1xf32>
    %9 = vector.broadcast %8 : vector<8x1xf32> to vector<8x128xf32>
    %10 = arith.mulf %7, %9 : vector<8x128xf32>
    %c0_9 = arith.constant 0 : index
    %c0_10 = arith.constant 0 : index
    %11 = vector.load %arg4[%c0_9, %c0_10] : memref<8x1xf32, #tpu.memory_space<vmem>>, vector<8x1xf32>
    %12 = vector.broadcast %11 : vector<8x1xf32> to vector<8x128xf32>
    %13 = arith.addf %10, %12 : vector<8x128xf32>
    %cst_11 = arith.constant 0.000000e+00 : f32
    %14 = vector.broadcast %cst_11 : f32 to vector<8x128xf32>
    %15 = arith.maximumf %13, %14 : vector<8x128xf32>
    %cst_12 = arith.constant 0.000000e+00 : f32
    %16 = vector.shape_cast %2 : vector<1x128xi1> to vector<1x128xi1>
    %17 = vector.broadcast %16 : vector<1x128xi1> to vector<8x128xi1>
    %18 = vector.broadcast %cst_12 : f32 to vector<8x128xf32>
    %19 = arith.select %17, %15, %18 : vector<8x128xi1>, vector<8x128xf32>
    %cst_13 = arith.constant 0.000000e+00 : bf16
    %20 = vector.broadcast %cst_13 : bf16 to vector<8x128xbf16>
    %c0_14 = arith.constant 0 : index
    %c0_15 = arith.constant 0 : index
    %21 = vector.load %arg14[%c0_14, %c0_15] : memref<8x384xbf16, #tpu.memory_space<vmem>>, vector<8x128xbf16>
    tpu.vector_store %arg14[%c0_14, %c0_15], %20 {strides = array<i32>} : memref<8x384xbf16, #tpu.memory_space<vmem>>, vector<8x128xbf16>,
    %cst_16 = arith.constant 0.000000e+00 : bf16
    %22 = vector.broadcast %cst_16 : bf16 to vector<8x128xbf16>
    %c0_17 = arith.constant 0 : index
    %c256 = arith.constant 256 : index
    %23 = vector.load %arg14[%c0_17, %c256] : memref<8x384xbf16, #tpu.memory_space<vmem>>, vector<8x128xbf16>
    tpu.vector_store %arg14[%c0_17, %c256], %22 {strides = array<i32>} : memref<8x384xbf16, #tpu.memory_space<vmem>>, vector<8x128xbf16>,
    %24 = arith.truncf %19 : vector<8x128xf32> to vector<8x128xbf16>
    %c0_18 = arith.constant 0 : index
    %c128_19 = arith.constant 128 : index
    %25 = vector.load %arg14[%c0_18, %c128_19] : memref<8x384xbf16, #tpu.memory_space<vmem>>, vector<8x128xbf16>
    tpu.vector_store %arg14[%c0_18, %c128_19], %24 {strides = array<i32>} : memref<8x384xbf16, #tpu.memory_space<vmem>>, vector<8x128xbf16>,
    %c0_20 = arith.constant 0 : index
    %c117 = arith.constant 117 : index
    %26 = vector.load %arg14[%c0_20, %c117] : memref<8x384xbf16, #tpu.memory_space<vmem>>, vector<8x128xbf16>
    %c0_21 = arith.constant 0 : index
    %c0_22 = arith.constant 0 : index
    %c0_23 = arith.constant 0 : index
    %27 = vector.load %arg5[%c0_21, %c0_22, %c0_23] : memref<9x8x8xbf16, #tpu.memory_space<vmem>>, vector<1x8x8xbf16>
    %28 = vector.shape_cast %27 : vector<1x8x8xbf16> to vector<8x8xbf16>
    %cst_24 = arith.constant dense<0.000000e+00> : vector<8x128xf32>
    %29 = tpu.matmul %28, %26, %cst_24 {dimension_numbers = #tpu.dot_dimension_numbers<[1], [0], [0], [1], [0, 0, 1, 1], [], []>} : vector<8x8xbf16>, vector<8x128xbf16>, vector<8x128xf32> -> vector<8x128xf32>
    %c0_25 = arith.constant 0 : index
    %c118 = arith.constant 118 : index
    %30 = vector.load %arg14[%c0_25, %c118] : memref<8x384xbf16, #tpu.memory_space<vmem>>, vector<8x128xbf16>
    %c1 = arith.constant 1 : index
    %c0_26 = arith.constant 0 : index
    %c0_27 = arith.constant 0 : index
    %31 = vector.load %arg5[%c1, %c0_26, %c0_27] : memref<9x8x8xbf16, #tpu.memory_space<vmem>>, vector<1x8x8xbf16>
    %32 = vector.shape_cast %31 : vector<1x8x8xbf16> to vector<8x8xbf16>
    %cst_28 = arith.constant dense<0.000000e+00> : vector<8x128xf32>
    %33 = tpu.matmul %32, %30, %cst_28 {dimension_numbers = #tpu.dot_dimension_numbers<[1], [0], [0], [1], [0, 0, 1, 1], [], []>} : vector<8x8xbf16>, vector<8x128xbf16>, vector<8x128xf32> -> vector<8x128xf32>
    %34 = arith.addf %29, %33 : vector<8x128xf32>
    %c0_29 = arith.constant 0 : index
    %c119 = arith.constant 119 : index
    %35 = vector.load %arg14[%c0_29, %c119] : memref<8x384xbf16, #tpu.memory_space<vmem>>, vector<8x128xbf16>
    %c2 = arith.constant 2 : index
    %c0_30 = arith.constant 0 : index
    %c0_31 = arith.constant 0 : index
    %36 = vector.load %arg5[%c2, %c0_30, %c0_31] : memref<9x8x8xbf16, #tpu.memory_space<vmem>>, vector<1x8x8xbf16>
    %37 = vector.shape_cast %36 : vector<1x8x8xbf16> to vector<8x8xbf16>
    %cst_32 = arith.constant dense<0.000000e+00> : vector<8x128xf32>
    %38 = tpu.matmul %37, %35, %cst_32 {dimension_numbers = #tpu.dot_dimension_numbers<[1], [0], [0], [1], [0, 0, 1, 1], [], []>} : vector<8x8xbf16>, vector<8x128xbf16>, vector<8x128xf32> -> vector<8x128xf32>
    %39 = arith.addf %34, %38 : vector<8x128xf32>
    %c0_33 = arith.constant 0 : index
    %c127 = arith.constant 127 : index
    %40 = vector.load %arg14[%c0_33, %c127] : memref<8x384xbf16, #tpu.memory_space<vmem>>, vector<8x128xbf16>
    %c3 = arith.constant 3 : index
    %c0_34 = arith.constant 0 : index
    %c0_35 = arith.constant 0 : index
    %41 = vector.load %arg5[%c3, %c0_34, %c0_35] : memref<9x8x8xbf16, #tpu.memory_space<vmem>>, vector<1x8x8xbf16>
    %42 = vector.shape_cast %41 : vector<1x8x8xbf16> to vector<8x8xbf16>
    %cst_36 = arith.constant dense<0.000000e+00> : vector<8x128xf32>
    %43 = tpu.matmul %42, %40, %cst_36 {dimension_numbers = #tpu.dot_dimension_numbers<[1], [0], [0], [1], [0, 0, 1, 1], [], []>} : vector<8x8xbf16>, vector<8x128xbf16>, vector<8x128xf32> -> vector<8x128xf32>
    %44 = arith.addf %39, %43 : vector<8x128xf32>
    %c0_37 = arith.constant 0 : index
    %c128_38 = arith.constant 128 : index
    %45 = vector.load %arg14[%c0_37, %c128_38] : memref<8x384xbf16, #tpu.memory_space<vmem>>, vector<8x128xbf16>
    %c4 = arith.constant 4 : index
    %c0_39 = arith.constant 0 : index
    %c0_40 = arith.constant 0 : index
    %46 = vector.load %arg5[%c4, %c0_39, %c0_40] : memref<9x8x8xbf16, #tpu.memory_space<vmem>>, vector<1x8x8xbf16>
    %47 = vector.shape_cast %46 : vector<1x8x8xbf16> to vector<8x8xbf16>
    %cst_41 = arith.constant dense<0.000000e+00> : vector<8x128xf32>
    %48 = tpu.matmul %47, %45, %cst_41 {dimension_numbers = #tpu.dot_dimension_numbers<[1], [0], [0], [1], [0, 0, 1, 1], [], []>} : vector<8x8xbf16>, vector<8x128xbf16>, vector<8x128xf32> -> vector<8x128xf32>
    %49 = arith.addf %44, %48 : vector<8x128xf32>
    %c0_42 = arith.constant 0 : index
    %c129 = arith.constant 129 : index
    %50 = vector.load %arg14[%c0_42, %c129] : memref<8x384xbf16, #tpu.memory_space<vmem>>, vector<8x128xbf16>
    %c5 = arith.constant 5 : index
    %c0_43 = arith.constant 0 : index
    %c0_44 = arith.constant 0 : index
    %51 = vector.load %arg5[%c5, %c0_43, %c0_44] : memref<9x8x8xbf16, #tpu.memory_space<vmem>>, vector<1x8x8xbf16>
    %52 = vector.shape_cast %51 : vector<1x8x8xbf16> to vector<8x8xbf16>
    %cst_45 = arith.constant dense<0.000000e+00> : vector<8x128xf32>
    %53 = tpu.matmul %52, %50, %cst_45 {dimension_numbers = #tpu.dot_dimension_numbers<[1], [0], [0], [1], [0, 0, 1, 1], [], []>} : vector<8x8xbf16>, vector<8x128xbf16>, vector<8x128xf32> -> vector<8x128xf32>
    %54 = arith.addf %49, %53 : vector<8x128xf32>
    %c0_46 = arith.constant 0 : index
    %c137 = arith.constant 137 : index
    %55 = vector.load %arg14[%c0_46, %c137] : memref<8x384xbf16, #tpu.memory_space<vmem>>, vector<8x128xbf16>
    %c6 = arith.constant 6 : index
    %c0_47 = arith.constant 0 : index
    %c0_48 = arith.constant 0 : index
    %56 = vector.load %arg5[%c6, %c0_47, %c0_48] : memref<9x8x8xbf16, #tpu.memory_space<vmem>>, vector<1x8x8xbf16>
    %57 = vector.shape_cast %56 : vector<1x8x8xbf16> to vector<8x8xbf16>
    %cst_49 = arith.constant dense<0.000000e+00> : vector<8x128xf32>
    %58 = tpu.matmul %57, %55, %cst_49 {dimension_numbers = #tpu.dot_dimension_numbers<[1], [0], [0], [1], [0, 0, 1, 1], [], []>} : vector<8x8xbf16>, vector<8x128xbf16>, vector<8x128xf32> -> vector<8x128xf32>
    %59 = arith.addf %54, %58 : vector<8x128xf32>
    %c0_50 = arith.constant 0 : index
    %c138 = arith.constant 138 : index
    %60 = vector.load %arg14[%c0_50, %c138] : memref<8x384xbf16, #tpu.memory_space<vmem>>, vector<8x128xbf16>
    %c7 = arith.constant 7 : index
    %c0_51 = arith.constant 0 : index
    %c0_52 = arith.constant 0 : index
    %61 = vector.load %arg5[%c7, %c0_51, %c0_52] : memref<9x8x8xbf16, #tpu.memory_space<vmem>>, vector<1x8x8xbf16>
    %62 = vector.shape_cast %61 : vector<1x8x8xbf16> to vector<8x8xbf16>
    %cst_53 = arith.constant dense<0.000000e+00> : vector<8x128xf32>
    %63 = tpu.matmul %62, %60, %cst_53 {dimension_numbers = #tpu.dot_dimension_numbers<[1], [0], [0], [1], [0, 0, 1, 1], [], []>} : vector<8x8xbf16>, vector<8x128xbf16>, vector<8x128xf32> -> vector<8x128xf32>
    %64 = arith.addf %59, %63 : vector<8x128xf32>
    %c0_54 = arith.constant 0 : index
    %c139 = arith.constant 139 : index
    %65 = vector.load %arg14[%c0_54, %c139] : memref<8x384xbf16, #tpu.memory_space<vmem>>, vector<8x128xbf16>
    %c8 = arith.constant 8 : index
    %c0_55 = arith.constant 0 : index
    %c0_56 = arith.constant 0 : index
    %66 = vector.load %arg5[%c8, %c0_55, %c0_56] : memref<9x8x8xbf16, #tpu.memory_space<vmem>>, vector<1x8x8xbf16>
    %67 = vector.shape_cast %66 : vector<1x8x8xbf16> to vector<8x8xbf16>
    %cst_57 = arith.constant dense<0.000000e+00> : vector<8x128xf32>
    %68 = tpu.matmul %67, %65, %cst_57 {dimension_numbers = #tpu.dot_dimension_numbers<[1], [0], [0], [1], [0, 0, 1, 1], [], []>} : vector<8x8xbf16>, vector<8x128xbf16>, vector<8x128xf32> -> vector<8x128xf32>
    %69 = arith.addf %64, %68 : vector<8x128xf32>
    %c0_58 = arith.constant 0 : index
    %c0_59 = arith.constant 0 : index
    %70 = vector.load %arg6[%c0_58, %c0_59] : memref<8x1xf32, #tpu.memory_space<vmem>>, vector<8x1xf32>
    %71 = vector.broadcast %70 : vector<8x1xf32> to vector<8x128xf32>
    %72 = arith.mulf %69, %71 : vector<8x128xf32>
    %c0_60 = arith.constant 0 : index
    %c0_61 = arith.constant 0 : index
    %73 = vector.load %arg7[%c0_60, %c0_61] : memref<8x1xf32, #tpu.memory_space<vmem>>, vector<8x1xf32>
    %74 = vector.broadcast %73 : vector<8x1xf32> to vector<8x128xf32>
    %75 = arith.addf %72, %74 : vector<8x128xf32>
    %c0_62 = arith.constant 0 : index
    %c0_63 = arith.constant 0 : index
    %c128_64 = arith.constant 128 : index
    %76 = vector.load %arg8[%c0_62, %c0_63, %c128_64] : memref<1x8x384xbf16, #tpu.memory_space<vmem>>, vector<1x8x128xbf16>
    %77 = vector.shape_cast %76 : vector<1x8x128xbf16> to vector<8x128xbf16>
    %c0_65 = arith.constant 0 : index
    %c0_66 = arith.constant 0 : index
    %c0_67 = arith.constant 0 : index
    %78 = vector.load %arg9[%c0_65, %c0_66, %c0_67] : memref<1x8x8xbf16, #tpu.memory_space<vmem>>, vector<1x8x8xbf16>
    %79 = vector.shape_cast %78 : vector<1x8x8xbf16> to vector<8x8xbf16>
    %cst_68 = arith.constant dense<0.000000e+00> : vector<8x128xf32>
    %80 = tpu.matmul %79, %77, %cst_68 {dimension_numbers = #tpu.dot_dimension_numbers<[1], [0], [0], [1], [0, 0, 1, 1], [], []>} : vector<8x8xbf16>, vector<8x128xbf16>, vector<8x128xf32> -> vector<8x128xf32>
    %c0_69 = arith.constant 0 : index
    %c0_70 = arith.constant 0 : index
    %81 = vector.load %arg10[%c0_69, %c0_70] : memref<8x1xf32, #tpu.memory_space<vmem>>, vector<8x1xf32>
    %82 = vector.broadcast %81 : vector<8x1xf32> to vector<8x128xf32>
    %83 = arith.mulf %80, %82 : vector<8x128xf32>
    %84 = arith.addf %75, %83 : vector<8x128xf32>
    %c0_71 = arith.constant 0 : index
    %c0_72 = arith.constant 0 : index
    %85 = vector.load %arg11[%c0_71, %c0_72] : memref<8x1xf32, #tpu.memory_space<vmem>>, vector<8x1xf32>
    %86 = vector.broadcast %85 : vector<8x1xf32> to vector<8x128xf32>
    %87 = arith.addf %84, %86 : vector<8x128xf32>
    %cst_73 = arith.constant 0.000000e+00 : f32
    %88 = vector.broadcast %cst_73 : f32 to vector<8x128xf32>
    %89 = arith.maximumf %87, %88 : vector<8x128xf32>
    %cst_74 = arith.constant 0.000000e+00 : f32
    %90 = vector.shape_cast %2 : vector<1x128xi1> to vector<1x128xi1>
    %91 = vector.broadcast %90 : vector<1x128xi1> to vector<8x128xi1>
    %92 = vector.broadcast %cst_74 : f32 to vector<8x128xf32>
    %93 = arith.select %91, %89, %92 : vector<8x128xi1>, vector<8x128xf32>
    %cst_75 = arith.constant 0.000000e+00 : f32
    %94 = vector.broadcast %cst_75 : f32 to vector<8x128xf32>
    %c0_76 = arith.constant 0 : index
    %c0_77 = arith.constant 0 : index
    %c0_78 = arith.constant 0 : index
    %95 = vector.load %arg13[%c0_76, %c0_77, %c0_78] : memref<1x8x384xf32, #tpu.memory_space<vmem>>, vector<1x8x128xf32>
    %96 = vector.shape_cast %95 : vector<1x8x128xf32> to vector<8x128xf32>
    %97 = vector.shape_cast %94 : vector<8x128xf32> to vector<1x8x128xf32>
    tpu.vector_store %arg13[%c0_76, %c0_77, %c0_78], %97 {strides = array<i32>} : memref<1x8x384xf32, #tpu.memory_space<vmem>>, vector<1x8x128xf32>,
    %cst_79 = arith.constant 0.000000e+00 : f32
    %98 = vector.broadcast %cst_79 : f32 to vector<8x128xf32>
    %c0_80 = arith.constant 0 : index
    %c0_81 = arith.constant 0 : index
    %c256_82 = arith.constant 256 : index
    %99 = vector.load %arg13[%c0_80, %c0_81, %c256_82] : memref<1x8x384xf32, #tpu.memory_space<vmem>>, vector<1x8x128xf32>
    %100 = vector.shape_cast %99 : vector<1x8x128xf32> to vector<8x128xf32>
    %101 = vector.shape_cast %98 : vector<8x128xf32> to vector<1x8x128xf32>
    tpu.vector_store %arg13[%c0_80, %c0_81, %c256_82], %101 {strides = array<i32>} : memref<1x8x384xf32, #tpu.memory_space<vmem>>, vector<1x8x128xf32>,
    %c0_83 = arith.constant 0 : index
    %c0_84 = arith.constant 0 : index
    %c128_85 = arith.constant 128 : index
    %102 = vector.load %arg13[%c0_83, %c0_84, %c128_85] : memref<1x8x384xf32, #tpu.memory_space<vmem>>, vector<1x8x128xf32>
    %103 = vector.shape_cast %102 : vector<1x8x128xf32> to vector<8x128xf32>
    %104 = vector.shape_cast %93 : vector<8x128xf32> to vector<1x8x128xf32>
    tpu.vector_store %arg13[%c0_83, %c0_84, %c128_85], %104 {strides = array<i32>} : memref<1x8x384xf32, #tpu.memory_space<vmem>>, vector<1x8x128xf32>,
    return
  }
  func.func @transform_0(%arg0: i32) -> (i32, i32, i32) {
    %c0_i32 = arith.constant 0 : i32
    %c0_i32_0 = arith.constant 0 : i32
    %c0_i32_1 = arith.constant 0 : i32
    return %arg0, %c0_i32, %c0_i32_0 : i32, i32, i32
  }
  func.func @transform_1(%arg0: i32) -> (i32, i32, i32) {
    %c0_i32 = arith.constant 0 : i32
    %c0_i32_0 = arith.constant 0 : i32
    %c0_i32_1 = arith.constant 0 : i32
    %c0_i32_2 = arith.constant 0 : i32
    return %c0_i32, %c0_i32_0, %c0_i32_1 : i32, i32, i32
  }
  func.func @transform_2(%arg0: i32) -> (i32, i32) {
    %c0_i32 = arith.constant 0 : i32
    %c0_i32_0 = arith.constant 0 : i32
    %c0_i32_1 = arith.constant 0 : i32
    return %c0_i32, %c0_i32_0 : i32, i32
  }
  func.func @transform_3(%arg0: i32) -> (i32, i32) {
    %c0_i32 = arith.constant 0 : i32
    %c0_i32_0 = arith.constant 0 : i32
    %c0_i32_1 = arith.constant 0 : i32
    return %c0_i32, %c0_i32_0 : i32, i32
  }
  func.func @transform_4(%arg0: i32) -> (i32, i32, i32) {
    %c0_i32 = arith.constant 0 : i32
    %c0_i32_0 = arith.constant 0 : i32
    %c0_i32_1 = arith.constant 0 : i32
    %c0_i32_2 = arith.constant 0 : i32
    return %c0_i32, %c0_i32_0, %c0_i32_1 : i32, i32, i32
  }
  func.func @transform_5(%arg0: i32) -> (i32, i32) {
    %c0_i32 = arith.constant 0 : i32
    %c0_i32_0 = arith.constant 0 : i32
    %c0_i32_1 = arith.constant 0 : i32
    return %c0_i32, %c0_i32_0 : i32, i32
  }
  func.func @transform_6(%arg0: i32) -> (i32, i32) {
    %c0_i32 = arith.constant 0 : i32
    %c0_i32_0 = arith.constant 0 : i32
    %c0_i32_1 = arith.constant 0 : i32
    return %c0_i32, %c0_i32_0 : i32, i32
  }
  func.func @transform_7(%arg0: i32) -> (i32, i32, i32) {
    %c0_i32 = arith.constant 0 : i32
    %c0_i32_0 = arith.constant 0 : i32
    %c0_i32_1 = arith.constant 0 : i32
    return %arg0, %c0_i32, %c0_i32_0 : i32, i32, i32
  }
  func.func @transform_8(%arg0: i32) -> (i32, i32, i32) {
    %c0_i32 = arith.constant 0 : i32
    %c0_i32_0 = arith.constant 0 : i32
    %c0_i32_1 = arith.constant 0 : i32
    %c0_i32_2 = arith.constant 0 : i32
    return %c0_i32, %c0_i32_0, %c0_i32_1 : i32, i32, i32
  }
  func.func @transform_9(%arg0: i32) -> (i32, i32) {
    %c0_i32 = arith.constant 0 : i32
    %c0_i32_0 = arith.constant 0 : i32
    %c0_i32_1 = arith.constant 0 : i32
    return %c0_i32, %c0_i32_0 : i32, i32
  }
  func.func @transform_10(%arg0: i32) -> (i32, i32) {
    %c0_i32 = arith.constant 0 : i32
    %c0_i32_0 = arith.constant 0 : i32
    %c0_i32_1 = arith.constant 0 : i32
    return %c0_i32, %c0_i32_0 : i32, i32
  }
  func.func @transform_11(%arg0: i32) -> (i32, i32) {
    %c0_i32 = arith.constant 0 : i32
    %c0_i32_0 = arith.constant 0 : i32
    %c0_i32_1 = arith.constant 0 : i32
    return %c0_i32, %c0_i32_0 : i32, i32
  }
  func.func @transform_12(%arg0: i32) -> (i32, i32, i32) {
    %c0_i32 = arith.constant 0 : i32
    %c0_i32_0 = arith.constant 0 : i32
    %c0_i32_1 = arith.constant 0 : i32
    return %arg0, %c0_i32, %c0_i32_0 : i32, i32, i32
  }
}

</mosaic_0001>

<bundles_post_ra>
// kernel: basic_block_forward.1
= control target key start
LH: loop header
LB: loop body
LE: loop exit
PB: predicated region body
PF: predicated region fallthrough
CT: control target
= control target key end

     0   :  { %s1455_s21 = smov 0   ;;  %s1599_s0 = inlined_call_operand.vmem [shape: bf16[2,40,384], index: 0, kind: input, shape index: {}]   ;;  %s1600_s1 = inlined_call_operand.vmem [shape: bf16[1,8,40], index: 1, kind: input, shape index: {}]   ;;  %s1601_s2 = inlined_call_operand.vmem [shape: f32[8,1], index: 2, kind: input, shape index: {}]   ;;  %s1602_s3 = inlined_call_operand.vmem [shape: f32[8,1], index: 3, kind: input, shape index: {}]   ;;  %s1603_s4 = inlined_call_operand.vmem [shape: bf16[9,8,8], index: 4, kind: input, shape index: {}]   ;;  %s1604_s5 = inlined_call_operand.vmem [shape: f32[8,1], index: 5, kind: input, shape index: {}]   ;;  %s1605_s6 = inlined_call_operand.vmem [shape: f32[8,1], index: 6, kind: input, shape index: {}]   ;;  %s1606_s7 = inlined_call_operand.vmem [shape: bf16[2,8,384], index: 7, kind: input, shape index: {}]   ;;  %s1607_s8 = inlined_call_operand.vmem [shape: bf16[1,8,8], index: 8, kind: input, shape index: {}]   ;;  %s1608_s9 = inlined_call_operand.vmem [shape: f32[8,1], index: 9, kind: input, shape index: {}]   ;;  %s1609_s10 = inlined_call_operand.vmem [shape: f32[8,1], index: 10, kind: input, shape index: {}]   ;;  %s1610_s11 = inlined_call_operand.vmem [shape: f32[1,128], index: 11, kind: input, shape index: {}]   ;;  %s1611_s12 = inlined_call_operand.vmem [shape: f32[2,8,384], index: 12, kind: output, shape index: {}]  }
   0x1 LB: > { %s1181_s22 = sadd.s32 4294967295, %s1377_s21   ;;  %p1185_p0 = scmp.ge.s32.totalorder %s1377_s21, 1  ;;  %s1377_s21 = sphi %s1455_s21, %s22_s21  }
   0x2   : > { %p372_p1 = scmp.lt.s32.totalorder %s1377_s21, 3 }
   0x4   : > { %p373_p2 = pnand %p1185_p0, %p372_p1 }
   0x5   : > { %p419_p3 = scmp.lt.s32.totalorder (!%p373_p2), %s1181_s22, 1  ;;  %v1379_v0 = vmov (!%p373_p2), 0.0   ;;  %vm1380_vm0 = vmmov (!%p373_p2), 0   ;;  %v506_v1 = vld [vmem:[%s1601_s2] sm:$0xff] (!%p373_p2)  ;;  %v1381_v2 = vmov (!%p373_p2), 0   ;;  %vm462_vm1 = vcmask (!%p373_p2), 1043456  }
   0x6   : > { %376 = sbr.rel (%p373_p2) target bundleno = 671 (0x29f), region = 68  ;;  %1241 = vmatprep.subr.bf16.mxu0 (!%p373_p2), %v1379_v0  ;;  %1247 = vmatprep.mubr.msk.bf16.mxu0 (!%p373_p2), %vm1380_vm0, %v1379_v0  ;;  %528 = vst [vmem:[#allocation2] sm:$0xf] (!%p373_p2), %v1381_v2  ;;  %529 = vst [vmem:[#allocation2 + $0x8] sm:$0xf] (!%p373_p2), %v1381_v2  ;;  %v513_v3 = vld [vmem:[%s1602_s3] sm:$0xff] (!%p373_p2)  ;;  %v522_v9 = vlaneseq (!%p373_p2) }
   0x7   : > { %1362 = vset.pattern.permute.xlu0 (!%p373_p2), %v1381_v2  ;;  %1269 = vmatprep.subr.bf16.mxu1 (!%p373_p2), %v1379_v0  ;;  %v442_v8 = vld [vmem:[%s1600_s1] sm:$0xf] (!%p373_p2)  ;;  %vm458_vm2 = vcmask (!%p373_p2), 326656   ;;  %s1382_s17 = smov (!%p373_p2), 127   ;;  %s1383_s18 = smov (!%p373_p2), 1   ;;  %vm707_vm5 = vcmask (!%p373_p2), 7168  }
   0x8   : > { %509 = vperm.xlu0 (!%p373_p2), %1362, %v506_v1   ;;  %1271 = vmatprep.mubr.msk.bf16.mxu1 (!%p373_p2), %vm1380_vm0, %v1379_v0  ;;  %v435_v10 = vld [vmem:[%s1610_s11] sm:$0x1] (!%p373_p2)  ;;  %v523_v11 = vshrl.u32 (!%p373_p2), %v522_v9, 7  ;;  %s1384_s19 = smov (!%p373_p2), 10   ;;  %s1385_s20 = smov (!%p373_p2), 119   ;;  %vm547_vm6 = vcmask (!%p373_p2), 64512  }
   0x9   : > { %1363 = vset.pattern.permute.xlu1 (!%p373_p2), %v1381_v2  ;;  %vm436_vm3 = vcmp.ne.f32.partialorder (!%p373_p2), %v435_v10, 0.0  ;;  %s1386_s23 = smov (!%p373_p2), 11   ;;  %s1387_s24 = smov (!%p373_p2), 118   ;;  %v1032_v32 = vld [vmem:[%s1604_s5] sm:$0xff] (!%p373_p2)  ;;  %v1200_v42 = vld [vmem:[%s1603_s4 + $0xc] sm:$0xf] (!%p373_p2) }
   0xa   : > { %v524_v13 = vsub.s32 (!%p373_p2), 0, %v523_v11  ;;  %v521_v14 = vsel (!%p373_p2), %vm436_vm3, 1, %v1381_v2  ;;  %s1389_s26 = smov (!%p373_p2), 117   ;;  %v1094_v33 = vld [vmem:[%s1608_s9] sm:$0xff] (!%p373_p2)  ;;  %vm545_vm7 = vcmask (!%p373_p2), 80896   ;;  %vm818_vm8 = vcmask (!%p373_p2), 1039360  }
   0xb   : > { %v1039_v34 = vld [vmem:[%s1605_s6] sm:$0xff] (!%p373_p2)  ;;  %vm598_vm9 = vcmask (!%p373_p2), 89088   ;;  %v1202_v54 = vld [vmem:[%s1603_s4 + $0x10] sm:$0xf] (!%p373_p2)  ;;  %vm652_vm10 = vcmask (!%p373_p2), 72704   ;;  %vm873_vm11 = vcmask (!%p373_p2), 973824  }
   0xc   : > { %516 = vperm.xlu0 (!%p373_p2), %1362, %v513_v3   ;;  %v1493_v16 = vrot.slane (!%p373_p2), %v521_v14, %v524_v13  ;;  %v1102_v35 = vld [vmem:[%s1609_s10] sm:$0xff] (!%p373_p2)  ;;  %vm928_vm12 = vcmask (!%p373_p2), 965632   ;;  %v1208_v10 = vld [vmem:[%s1603_s4 + $0x18] sm:$0xf] (!%p373_p2)  ;;  %vm983_vm13 = vcmask (!%p373_p2), 957440  }
   0xd   : > { %s1613_s22 = smov (!%p419_p3, %s1181_s22), 1  ;;  %v1193_v50 = vld [vmem:[%s1603_s4 + $0x4] sm:$0xf]  ;;  %v533_v61 = vld [vmem:[%s1603_s4] sm:$0xf] }
   0xe   : > { %s1340_s25 = smul.u32 60, %s1613_s22  ;;  %vm526_vm4 = vcmp.eq.s32.totalorder %v1493_v16, 1 }
   0xf   : > { %s1341_s27 = smul.u32 12, %s1613_s22 }
  0x10   : > { %s423_s30 = scalar_lea.vmem %s1599_s0, %s1340_s25  ;;  %s1388_s25 = smov 9  }
  0x11   : > { %v1364_v4 = vld [vmem:[%s423_s30 + $0x4] ss:$12 sps:$4 sm:$0xff]   ;;  %v1365_v5 = vld [vmem:[%s423_s30 + $0x1c] ss:$12 sps:$4 sm:$0xff]   ;;  %v1366_v6 = vld [vmem:[%s423_s30 + $0x34] ss:$0 sps:$4 sm:$0xff]   ;;  %s428_s14 = scalar_lea.vmem %s1606_s7, %s1341_s27 }
  0x12   : > { %1242 = vmatpush3.bf16.msra.mxu0 %v1364_v4  ;;  %v464_v7 = vsel %vm462_vm1, %v1366_v6, 0  ;;  %v1204_v4 = vld [vmem:[%s1603_s4 + $0x14] sm:$0xf]  ;;  %v1046_v6 = vld [vmem:[%s428_s14 + $0x4] sm:$0xf]  ;;  %s1342_s27 = smul.u32 24, %s1613_s22 }
  0x13   : > { %1243 = vmatprep.subr.bf16.mxu0 %v1379_v0 }
  0x14   : > { %s433_s30 = scalar_lea.vmem %s1611_s12, %s1342_s27 }
  0x15   : > { %1111 = vst [vmem:[%s433_s30] sm:$0xff] %v1379_v0  ;;  %1112 = vst [vmem:[%s433_s30 + $0x10] sm:$0xff] %v1379_v0 }
  0x16   : > { %1244 = vmatpush3.bf16.msra.mxu0 %v1365_v5 }
  0x17   : > { %1245 = vmatprep.subr.bf16.mxu0 %v1379_v0 }
  0x1a   : > { %1246 = vmatpush3.bf16.msra.mxu0 %v464_v7  ;;  %v1198_v7 = vld [vmem:[%s1603_s4 + $0x8] sm:$0xf] }
  0x1b   : > { %1251 = vmatprep.subr.bf16.mxu0 %v1379_v0 }
  0x1d   : > { %1248 = vmatmul.mubr.msk.bf16.vlgmr.msra.gmra.mrb[0].mxu0 %vm458_vm2, %v442_v8  ;;  %v1052_v8 = vsel %vm462_vm1, %v1046_v6, 0 }
  0x1e   : > { %1253 = vmatprep.mubr.msk.bf16.mxu0 %vm1380_vm0, %v1379_v0 }
  0x87   : > { %v510_v12 = vpop.permute.xlu0 %509 }
  0x8b   : > { %v517_v19 = vpop.permute.xlu0 %516 }
  0xf0   : > { %v500_v15 = vpop.f32.mrb[0].mxu0 }
  0xf1   : > { %v512_v17 = vmul.f32 %v510_v12, %v500_v15  ;;  %v1249_v18 = vpop.f32.mrb[1].mxu0  ;;  %v1047_v12 = vld [vmem:[%s1607_s8] sm:$0xf] }
  0xf2   : > { %v503_v20 = vpop.f32.mrb[2].mxu0 }
  0xf3   : > { %v519_v21 = vadd.f32 %v517_v19, %v512_v17  ;;  %v1250_v22 = vpop.f32.mrb[3].mxu0  ;;  %v1210_v17 = vld [vmem:[%s1603_s4 + $0x1c] sm:$0xf]  ;;  %v1212_v19 = vld [vmem:[%s1603_s4 + $0x20] sm:$0xf] }
  0xf5   : > { %v520_v23 = vmax.f32 %v519_v21, 0.0 }
  0xf7   : > { %v527_v24 = vsel %vm526_vm4, %v520_v23, 0.0 }
  0xf8   : > { %v530_v25 = vpack.c.bf16 %v527_v24, %v527_v24 }
  0xfa   : > { %531 = vst [vmem:[#allocation2 + $0x4] sm:$0xf] %v530_v25 }
 0x101   : > { %v806_v26 = vld [vmem:[#allocation2 + $0x4] sm:$0xff] }
 0x102   : > { %v532_v27 = vld [vmem:[#allocation2] sm:$0xff]  ;;  %v1205_v28 = vcombine.low %v806_v26, %v806_v26  ;;  %v1206_v31 = vcombine.high %v806_v26, %v806_v26 }
 0x103   : > { %v1194_v29 = vcombine.low %v532_v27, %v532_v27  ;;  %v1195_v30 = vcombine.high %v532_v27, %v532_v27  ;;  %v756_v43 = vld [vmem:[#allocation2 + $0x4] sm:$0xf] }
 0x104   : > { %814 = vrot.lane.b32.xlu0 %v1205_v28, %s1382_s17  ;;  %v763_v46 = vsel %vm462_vm1, %v756_v43, 0 }
 0x105   : > { %703 = vrot.lane.b32.xlu1 %v1194_v29, %s1383_s18 }
 0x108   : > { %541 = vrot.lane.b32.xlu0 %v1194_v29, %s1384_s19 }
 0x109   : > { %705 = vrot.lane.b32.xlu1 %v1195_v30, %s1383_s18 }
 0x10c   : > { %869 = vrot.lane.b32.xlu0 %v1205_v28, %s1385_s20 }
 0x10d   : > { %816 = vrot.lane.b32.xlu1 %v1206_v31, %s1382_s17 }
 0x110   : > { %594 = vrot.lane.b32.xlu0 %v1194_v29, %s1386_s23 }
 0x111   : > { %543 = vrot.lane.b32.xlu1 %v1195_v30, %s1384_s19 }
 0x114   : > { %924 = vrot.lane.b32.xlu0 %v1205_v28, %s1387_s24 }
 0x115   : > { %871 = vrot.lane.b32.xlu1 %v1206_v31, %s1385_s20 }
 0x118   : > { %648 = vrot.lane.b32.xlu0 %v1194_v29, %s1388_s25 }
 0x119   : > { %596 = vrot.lane.b32.xlu1 %v1195_v30, %s1386_s23 }
 0x11c   : > { %979 = vrot.lane.b32.xlu0 %v1205_v28, %s1389_s26 }
 0x11d   : > { %926 = vrot.lane.b32.xlu1 %v1206_v31, %s1387_s24 }
 0x120   : > { %1035 = vperm.xlu0 %1362, %v1032_v32  }
 0x121   : > { %650 = vrot.lane.b32.xlu1 %v1195_v30, %s1388_s25 }
 0x124   : > { %1097 = vperm.xlu0 %1362, %v1094_v33  }
 0x125   : > { %981 = vrot.lane.b32.xlu1 %v1206_v31, %s1389_s26 }
 0x129   : > { %1042 = vperm.xlu1 %1363, %v1039_v34  }
 0x12d   : > { %1105 = vperm.xlu1 %1363, %v1102_v35  }
 0x176   : > { %v815_v36 = vpop.permute.xlu0 %814 }
 0x177   : > { %v704_v37 = vpop.permute.xlu1 %703 }
 0x17a   : > { %v542_v38 = vpop.permute.xlu0 %541 }
 0x17b   : > { %v706_v39 = vpop.permute.xlu1 %705 }
 0x17c   : > { %v708_v40 = vsel %vm707_vm5, %v704_v37, %v706_v39 }
 0x17d   : > { %v713_v41 = vsel %vm462_vm1, %v708_v40, 0 }
 0x17e   : > { %1270 = vmatpush3.bf16.msra.mxu1 %v713_v41  ;;  %v870_v45 = vpop.permute.xlu0 %869 }
 0x17f   : > { %v817_v44 = vpop.permute.xlu1 %816  ;;  %1275 = vmatprep.subr.bf16.mxu1 %v1379_v0 }
 0x180   : > { %v819_v53 = vsel %vm818_vm8, %v815_v36, %v817_v44 }
 0x181   : > { %1272 = vmatmul.mubr.msk.bf16.vlgmr.msra.gmra.mrb[0].mxu1 %vm547_vm6, %v1200_v42  ;;  %v824_v57 = vsel %vm462_vm1, %v819_v53, 0 }
 0x182   : > { %1276 = vmatpush3.bf16.msra.mxu1 %v763_v46  ;;  %1277 = vmatprep.mubr.msk.bf16.mxu1 %vm1380_vm0, %v1379_v0  ;;  %v595_v51 = vpop.permute.xlu0 %594 }
 0x183   : > { %v544_v47 = vpop.permute.xlu1 %543  ;;  %1281 = vmatprep.subr.bf16.mxu1 %v1379_v0 }
 0x184   : > { %v546_v48 = vsel %vm545_vm7, %v542_v38, %v544_v47 }
 0x185   : > { %v552_v49 = vsel %vm462_vm1, %v546_v48, 0 }
 0x186   : > { %1252 = vmatpush3.bf16.msra.mxu0 %v552_v49  ;;  %v925_v58 = vpop.permute.xlu0 %924 }
 0x187   : > { %v872_v52 = vpop.permute.xlu1 %871  ;;  %1257 = vmatprep.subr.bf16.mxu0 %v1379_v0 }
 0x188   : > { %v874_v3 = vsel %vm873_vm11, %v870_v45, %v872_v52 }
 0x189   : > { %1254 = vmatmul.mubr.msk.bf16.vlgmr.msra.gmra.mrb[4].mxu0 %vm547_vm6, %v1193_v50  ;;  %v879_v5 = vsel %vm462_vm1, %v874_v3, 0 }
 0x18a   : > { %1259 = vmatprep.mubr.msk.bf16.mxu0 %vm1380_vm0, %v1379_v0  ;;  %v649_v62 = vpop.permute.xlu0 %648 }
 0x18b   : > { %v597_v55 = vpop.permute.xlu1 %596 }
 0x18c   : > { %v599_v56 = vsel %vm598_vm9, %v595_v51, %v597_v55 }
 0x18d   : > { %v604_v59 = vsel %vm462_vm1, %v599_v56, 0  ;;  %1278 = vmatmul.mubr.msk.bf16.vlgmr.msra.gmra.mrb[0].mxu1 %vm547_vm6, %v1202_v54 }
 0x18e   : > { %1282 = vmatpush3.bf16.msra.mxu1 %v824_v57  ;;  %1258 = vmatpush3.bf16.msra.mxu0 %v604_v59  ;;  %v980_v14 = vpop.permute.xlu0 %979 }
 0x18f   : > { %v927_v60 = vpop.permute.xlu1 %926  ;;  %1263 = vmatprep.subr.bf16.mxu0 %v1379_v0  ;;  %1283 = vmatprep.mubr.msk.bf16.mxu1 %vm1380_vm0, %v1379_v0 }
 0x190   : > { %1287 = vmatprep.subr.bf16.mxu1 %v1379_v0  ;;  %v929_v9 = vsel %vm928_vm12, %v925_v58, %v927_v60 }
 0x191   : > { %v934_v11 = vsel %vm462_vm1, %v929_v9, 0 }
 0x193   : > { %v651_v63 = vpop.permute.xlu1 %650 }
 0x194   : > { %v653_v1 = vsel %vm652_vm10, %v649_v62, %v651_v63 }
 0x195   : > { %v658_v2 = vsel %vm462_vm1, %v653_v1, 0  ;;  %1260 = vmatmul.mubr.msk.bf16.vlgmr.msra.gmra.mrb[4].mxu0 %vm547_vm6, %v533_v61 }
 0x196   : > { %1264 = vmatpush3.bf16.msra.mxu0 %v658_v2  ;;  %1265 = vmatprep.mubr.msk.bf16.mxu0 %vm1380_vm0, %v1379_v0 }
 0x197   : > { %1305 = vmatprep.subr.bf16.mxu0 %v1379_v0  ;;  %v982_v13 = vpop.permute.xlu1 %981 }
 0x198   : > { %v984_v15 = vsel %vm983_vm13, %v980_v14, %v982_v13 }
 0x199   : > { %1284 = vmatmul.mubr.msk.bf16.vlgmr.msra.gmra.mrb[0].mxu1 %vm547_vm6, %v1204_v4  ;;  %v989_v18 = vsel %vm462_vm1, %v984_v15, 0 }
 0x19a   : > { %1288 = vmatpush3.bf16.msra.mxu1 %v879_v5  ;;  %1289 = vmatprep.mubr.msk.bf16.mxu1 %vm1380_vm0, %v1379_v0 }
 0x19b   : > { %1293 = vmatprep.subr.bf16.mxu1 %v1379_v0 }
 0x19f   : > { %v1036_v28 = vpop.permute.xlu0 %1035 }
 0x1a1   : > { %1266 = vmatmul.mubr.msk.bf16.vlgmr.msra.gmra.mrb[4].mxu0 %vm547_vm6, %v1198_v7 }
 0x1a2   : > { %1306 = vmatpush3.bf16.msra.mxu0 %v1052_v8  ;;  %1307 = vmatprep.mubr.msk.bf16.mxu0 %vm1380_vm0, %v1379_v0 }
 0x1a3   : > { %v1098_v36 = vpop.permute.xlu0 %1097 }
 0x1a5   : > { %1290 = vmatmul.mubr.msk.bf16.vlgmr.msra.gmra.mrb[0].mxu1 %vm547_vm6, %v1208_v10 }
 0x1a6   : > { %1294 = vmatpush3.bf16.msra.mxu1 %v934_v11  ;;  %1295 = vmatprep.mubr.msk.bf16.mxu1 %vm1380_vm0, %v1379_v0 }
 0x1a7   : > { %1299 = vmatprep.subr.bf16.mxu1 %v1379_v0 }
 0x1a8   : > { %v1043_v32 = vpop.permute.xlu1 %1042 }
 0x1a9   : > { %1308 = vmatmul.mubr.msk.bf16.vlgmr.msra.gmra.mrb[8].mxu0 %vm547_vm6, %v1047_v12 }
 0x1ac   : > { %v1106_v39 = vpop.permute.xlu1 %1105 }
 0x1b1   : > { %1296 = vmatmul.mubr.msk.bf16.vlgmr.msra.gmra.mrb[0].mxu1 %vm547_vm6, %v1210_v17 }
 0x1b2   : > { %1300 = vmatpush3.bf16.msra.mxu1 %v989_v18  ;;  %1301 = vmatprep.mubr.msk.bf16.mxu1 %vm1380_vm0, %v1379_v0 }
 0x1bd   : > { %1302 = vmatmul.mubr.msk.bf16.vlgmr.msra.gmra.mrb[0].mxu1 %vm547_vm6, %v1212_v19 }
 0x274   : > { %v694_v20 = vpop.f32.mrb[4].mxu0 }
 0x275   : > { %v1267_v21 = vpop.f32.mrb[5].mxu0 }
 0x276   : > { %v697_v22 = vpop.f32.mrb[6].mxu0 }
 0x277   : > { %v1268_v23 = vpop.f32.mrb[7].mxu0 }
 0x27c   : > { %v1088_v24 = vpop.f32.mrb[8].mxu0 }
 0x27d   : > { %v1309_v25 = vpop.f32.mrb[9].mxu0  ;;  %v1100_v37 = vmul.f32 %v1098_v36, %v1088_v24 }
 0x27e   : > { %v1091_v26 = vpop.f32.mrb[10].mxu0 }
 0x27f   : > { %v1310_v27 = vpop.f32.mrb[11].mxu0 }
 0x290   : > { %v1025_v29 = vpop.f32.mrb[0].mxu1 }
 0x291   : > { %v1311_v30 = vadd.f32 %v1025_v29, %v694_v20  ;;  %v1303_v31 = vpop.f32.mrb[1].mxu1 }
 0x292   : > { %v1028_v33 = vpop.f32.mrb[2].mxu1 }
 0x293   : > { %v1038_v34 = vmul.f32 %v1311_v30, %v1036_v28  ;;  %v1304_v35 = vpop.f32.mrb[3].mxu1 }
 0x295   : > { %v1045_v38 = vadd.f32 %v1043_v32, %v1038_v34 }
 0x297   : > { %v1101_v0 = vadd.f32 %v1100_v37, %v1045_v38 }
 0x299   : > { %v1108_v40 = vadd.f32 %v1106_v39, %v1101_v0 }
 0x29b   : > { %v1109_v41 = vmax.f32 %v1108_v40, 0.0 }
 0x29d   : > { %v1110_v42 = vsel %vm526_vm4, %v1109_v41, 0.0 }
 0x29e   : > { %1113 = vst [vmem:[%s433_s30 + $0x8] sm:$0xff] %v1110_v42 }
 0x29f PF: > { %s22_s21 = sadd.s32 1, %s1377_s21  }
 0x2a0   : > { %p19_p4 = scmp.ge.s32.totalorder %s22_s21, 4  }
 0x2a2   :  { %21 = sbr.rel (!%p19_p4) target bundleno = 1 (0x1), region = 109 }

</bundles_post_ra>
